<compile_context>
chip_gen: v5e
topology: v5e:2x2
jax: 0.10.0
libtpu: 0.0.40
codegen_flags: <defaults>
</compile_context>

<pallas_src>
import functools

import jax
import jax.numpy as jnp
from jax.experimental import pallas as pl
from jax.experimental.pallas import tpu as pltpu


def _round_up(n, m):
    return ((n + m - 1) // m) * m


def make_tcrn_kernel(hidden, out_dim, bt, out_width):
    """Kernel closed over static layout constants."""
    H, O = hidden, out_dim
    pad = out_width - (3 * H + O)

    def kernel(xfa_ref, h0_ref, wfused_ref, wa_ref, bfc_ref, out_ref, hc_ref):
        f32 = jnp.float32
        s = pl.program_id(1)

        # Load the incoming hidden state once per batch tile (segment 0).
        @pl.when(s == 0)
        def _():
            hc_ref[...] = h0_ref[...]

        # --- ONE fused MXU pass per step:
        #     [x_flat | 1 | pad0 | h0 | h1 | h2] @ w_fused
        #   = [conv+bc | h0@W1b.T+b1 | h1@W2b.T+b2 | h2@W3b.T+b3]        ([bt, 4H])
        # x slab is padded to a 128-lane boundary so this concat is vreg-aligned.
        xh = jnp.concatenate([xfa_ref[0], hc_ref[...]], axis=-1)
        mix = jnp.dot(xh, wfused_ref[...], preferred_element_type=f32)

        # --- serial recurrent FC chain (dependent path): relu(a @ Wa.T + (h@Wb.T + b)).
        xc = jnp.maximum(mix[:, 0:H], 0.0)                      # temporal conv + ReLU
        nh0 = jnp.maximum(
            jnp.dot(xc, wa_ref[:, 0:H], preferred_element_type=f32)
            + mix[:, H:2 * H], 0.0)
        nh1 = jnp.maximum(
            jnp.dot(nh0, wa_ref[:, H:2 * H], preferred_element_type=f32)
            + mix[:, 2 * H:3 * H], 0.0)
        nh2 = jnp.maximum(
            jnp.dot(nh1, wa_ref[:, 2 * H:3 * H], preferred_element_type=f32)
            + mix[:, 3 * H:4 * H], 0.0)

        # --- flatten + F.relu (identity: nh2 >= 0) + classifier + log_softmax.
        logits = (jnp.dot(nh2, wa_ref[:, 3 * H:3 * H + O], preferred_element_type=f32)
                  + bfc_ref[0:1, 0:O])
        m = jnp.max(logits, axis=-1, keepdims=True)
        z = logits - m
        logp = z - jnp.log(jnp.sum(jnp.exp(z), axis=-1, keepdims=True))

        # --- carry hidden state to the next segment.
        hcat_new = jnp.concatenate([nh0, nh1, nh2], axis=-1)
        hc_ref[...] = hcat_new

        # --- single lane-dense output slab: [nh0 | nh1 | nh2 | logp | pad].
        pieces = [hcat_new, logp]
        if pad:
            pieces.append(jnp.zeros((logp.shape[0], pad), f32))
        out_ref[0] = jnp.concatenate(pieces, axis=-1)

    return kernel


def init_params(key, input_dim, hidden, output_dim, frames):
    """Deterministic PyTorch-default-style uniform init (U[-1/sqrt(fan_in), ..])."""
    ks = jax.random.split(key, 10)

    def u(k, shape, fan_in):
        bound = 1.0 / float(fan_in) ** 0.5
        return jax.random.uniform(k, shape, jnp.float32, -bound, bound)

    return {
        "wc": u(ks[0], (hidden, input_dim, frames), input_dim * frames),   # Conv1d [H, D, T]
        "bc": u(ks[1], (hidden,), input_dim * frames),
        "w1": u(ks[2], (hidden, 2 * hidden), 2 * hidden),                  # Linear [out, in]
        "b1": u(ks[3], (hidden,), 2 * hidden),
        "w2": u(ks[4], (hidden, 2 * hidden), 2 * hidden),
        "b2": u(ks[5], (hidden,), 2 * hidden),
        "w3": u(ks[6], (hidden, 2 * hidden), 2 * hidden),
        "b3": u(ks[7], (hidden,), 2 * hidden),
        "wfc": u(ks[8], (output_dim, hidden), hidden),
        "bfc": u(ks[9], (output_dim,), hidden),
    }


def pack_params(params, frames, input_dim):
    """One-time packing of all weights into two lane-dense, matmul-ready slabs.

    w_fused [XW + 3H, 4H]:
        rows 0:TD        : [ Wc_flat | 0     | 0     | 0     ]
        row  TD          : [ bc      | b1    | b2    | b3    ]   (multiplied by the ones column)
        rows TD+1:XW     : zero padding (x slab is lane-padded to XW = roundup(TD+1,128))
        rows XW:XW+3H    : blockdiag(W1b.T, W2b.T, W3b.T) placed in column blocks 1..3
    w_a [H, 4H]          : [ W1a.T | W2a.T | W3a.T | Wfc.T(pad) ]   (lane-dense)
    bfc_row [1, 128*]    : classifier bias.
    """
    H = params["w1"].shape[0]
    O = params["wfc"].shape[0]
    TD = frames * input_dim
    XW = _round_up(TD + 1, 128)
    assert O <= H, "classifier packing assumes output_dim <= hidden_size"
    f32 = jnp.float32

    # conv as matmul: out[b,h] = sum_{t,d} x[b,t,d] * wc[h,d,t]  ->  wc_flat[t*D+d, h]
    wc_flat = jnp.transpose(params["wc"], (2, 1, 0)).reshape(TD, H)

    # Linear(concat([a, h])) = a @ Wa.T + h @ Wb.T  with  W = [Wa | Wb]
    w1aT, w1bT = params["w1"][:, :H].T, params["w1"][:, H:].T
    w2aT, w2bT = params["w2"][:, :H].T, params["w2"][:, H:].T
    w3aT, w3bT = params["w3"][:, :H].T, params["w3"][:, H:].T

    w_fused = jnp.zeros((XW + 3 * H, 4 * H), f32)
    w_fused = w_fused.at[0:TD, 0:H].set(wc_flat)
    w_fused = w_fused.at[TD, 0:H].set(params["bc"])
    w_fused = w_fused.at[TD, H:2 * H].set(params["b1"])
    w_fused = w_fused.at[TD, 2 * H:3 * H].set(params["b2"])
    w_fused = w_fused.at[TD, 3 * H:4 * H].set(params["b3"])
    w_fused = w_fused.at[XW:XW + H, H:2 * H].set(w1bT)
    w_fused = w_fused.at[XW + H:XW + 2 * H, 2 * H:3 * H].set(w2bT)
    w_fused = w_fused.at[XW + 2 * H:XW + 3 * H, 3 * H:4 * H].set(w3bT)

    w_a = jnp.zeros((H, 4 * H), f32)
    w_a = w_a.at[:, 0:H].set(w1aT)
    w_a = w_a.at[:, H:2 * H].set(w2aT)
    w_a = w_a.at[:, 2 * H:3 * H].set(w3aT)
    w_a = w_a.at[:, 3 * H:3 * H + O].set(params["wfc"].T)

    bw = _round_up(max(O, 128), 128)
    bfc_row = jnp.zeros((1, bw), f32).at[0, :O].set(params["bfc"])
    return w_fused, w_a, bfc_row


@functools.partial(jax.jit, static_argnames=("hidden", "out_dim", "batch_tile"))
def tcrn_forward_sequence(xs, h, w_fused, w_a, bfc_row, *, hidden, out_dim,
                          batch_tile=None):
    """Run S chained segments in ONE pallas_call.

    xs: [S, B, T, D] f32, h: [3, B, H] f32 (initial hidden state)
    returns (log_probs [S, B, O], (nh0, nh1, nh2) each [S, B, H])
    """
    S, B, T, D = xs.shape
    H, O = hidden, out_dim
    TD = T * D
    XW = _round_up(TD + 1, 128)
    out_width = _round_up(3 * H + O, 128)
    bt = B if batch_tile is None else batch_tile
    assert B % bt == 0 and (bt == B or bt % 8 == 0)
    assert w_fused.shape == (XW + 3 * H, 4 * H)

    # x slab per segment: [x_flat | 1 | 0-pad]  (ones column folds bc/b1/b2/b3 into the
    # fused MXU pass; lane padding makes the in-kernel concat vreg-aligned).
    xfa = jnp.zeros((S, B, XW), jnp.float32)
    xfa = xfa.at[..., :TD].set(xs.reshape(S, B, TD).astype(jnp.float32))
    xfa = xfa.at[..., TD].set(1.0)
    hcat = jnp.swapaxes(h, 0, 1).reshape(B, 3 * H).astype(jnp.float32)

    kernel = make_tcrn_kernel(H, O, bt, out_width)
    out = pl.pallas_call(
        kernel,
        out_shape=jax.ShapeDtypeStruct((S, B, out_width), jnp.float32),
        grid_spec=pltpu.PrefetchScalarGridSpec(
            num_scalar_prefetch=0,
            grid=(B // bt, S),
            in_specs=[
                pl.BlockSpec((1, bt, XW), lambda b, s: (s, b, 0)),            # x: streamed per segment
                pl.BlockSpec((bt, 3 * H), lambda b, s: (b, 0)),               # initial hidden state
                pl.BlockSpec((XW + 3 * H, 4 * H), lambda b, s: (0, 0)),       # fused weight (resident)
                pl.BlockSpec((H, 4 * H), lambda b, s: (0, 0)),                # a-side weights (resident)
                pl.BlockSpec((1, bfc_row.shape[1]), lambda b, s: (0, 0)),     # classifier bias (resident)
            ],
            out_specs=pl.BlockSpec((1, bt, out_width), lambda b, s: (s, b, 0)),
            scratch_shapes=[pltpu.VMEM((bt, 3 * H), jnp.float32)],            # carried hidden state
        ),
        compiler_params=pltpu.CompilerParams(
            dimension_semantics=("parallel", "arbitrary")),
    )(xfa, hcat, w_fused, w_a, bfc_row)

    nh0 = out[..., 0:H]
    nh1 = out[..., H:2 * H]
    nh2 = out[..., 2 * H:3 * H]
    logp = out[..., 3 * H:3 * H + O]
    return logp, (nh0, nh1, nh2)


def tcrn_forward(x, h, w_fused, w_a, bfc_row, *, hidden, out_dim):
    """Single-segment forward matching the PyTorch module's signature.

    x: [B, T, D], h: [3, B, H] -> (log_probs [B, O], [nh0, nh1, nh2])
    """
    logp, (nh0, nh1, nh2) = tcrn_forward_sequence(
        x[None], h, w_fused, w_a, bfc_row, hidden=hidden, out_dim=out_dim)
    return logp[0], [nh0[0], nh1[0], nh2[0]]


def tcrn_reference(x, h, params):
    """Pure-JAX reference for one segment (matches the PyTorch module in eval mode)."""
    xp = jnp.transpose(x, (0, 2, 1))                        # [B, D, T]
    conv = jnp.einsum("bdt,hdt->bh", xp, params["wc"]) + params["bc"]
    xc = jax.nn.relu(conv)

    def layer(a, hh, w, b):
        return jax.nn.relu(jnp.concatenate([a, hh], axis=-1) @ w.T + b)

    nh0 = layer(xc, h[0], params["w1"], params["b1"])
    nh1 = layer(nh0, h[1], params["w2"], params["b2"])
    nh2 = layer(nh1, h[2], params["w3"], params["b3"])
    z = jax.nn.relu(nh2.reshape(nh2.shape[0], -1))
    logits = z @ params["wfc"].T + params["bfc"]
    return jax.nn.log_softmax(logits, axis=-1), [nh0, nh1, nh2]


def tcrn_reference_sequence(xs, h, params):
    """Chain the per-segment reference, carrying the hidden state."""
    logps, h0s, h1s, h2s = [], [], [], []
    hcur = h
    for s in range(xs.shape[0]):
        logp, hnew = tcrn_reference(xs[s], hcur, params)
        logps.append(logp)
        h0s.append(hnew[0]); h1s.append(hnew[1]); h2s.append(hnew[2])
        hcur = jnp.stack(hnew, axis=0)
    return (jnp.stack(logps), (jnp.stack(h0s), jnp.stack(h1s), jnp.stack(h2s)))


if __name__ == "__main__":
    input_dim = 16
    hidden = 32
    output_dim = 8
    frames = 3
    batch = 8          # f32 sublane minimum
    segments = 4       # chained inside ONE pallas_call

    key = jax.random.PRNGKey(0)
    kp, kx, kh = jax.random.split(key, 3)
    params = init_params(kp, input_dim, hidden, output_dim, frames)
    xs = jax.random.normal(kx, (segments, batch, frames, input_dim), dtype=jnp.float32)
    h0 = jax.random.normal(kh, (3, batch, hidden), dtype=jnp.float32)

    w_fused, w_a, bfc_row = pack_params(params, frames, input_dim)   # one-time packing

    # --- single-segment forward (module semantics) ---
    logp1, hnew1 = tcrn_forward(xs[0], h0, w_fused, w_a, bfc_row,
                                hidden=hidden, out_dim=output_dim)
    jax.block_until_ready(logp1)
    logp1_ref, hnew1_ref = tcrn_reference(xs[0], h0, params)
    assert jnp.allclose(logp1, logp1_ref, atol=1e-4, rtol=1e-4), "log_softmax mismatch"
    for a, b in zip(hnew1, hnew1_ref):
        assert jnp.allclose(a, b, atol=1e-4, rtol=1e-4), "hidden state mismatch"

    # --- multi-segment sequence, single launch, weights resident, h carried in VMEM ---
    logps, (nh0s, nh1s, nh2s) = tcrn_forward_sequence(
        xs, h0, w_fused, w_a, bfc_row, hidden=hidden, out_dim=output_dim)
    jax.block_until_ready(logps)
    logps_ref, (nh0r, nh1r, nh2r) = tcrn_reference_sequence(xs, h0, params)
    assert jnp.allclose(logps, logps_ref, atol=1e-4, rtol=1e-4), "seq log_softmax mismatch"
    assert jnp.allclose(nh0s, nh0r, atol=1e-4, rtol=1e-4), "seq nh0 mismatch"
    assert jnp.allclose(nh1s, nh1r, atol=1e-4, rtol=1e-4), "seq nh1 mismatch"
    assert jnp.allclose(nh2s, nh2r, atol=1e-4, rtol=1e-4), "seq nh2 mismatch"

    print("KERNEL_OK")
</pallas_src>

<mosaic_0001>
module attributes {stable_mosaic.version = 11 : i64} {
  func.func @kernel(%arg0: i32, %arg1: i32, %arg2: memref<1x8x128xf32, #tpu.memory_space<vmem>>, %arg3: memref<8x96xf32, #tpu.memory_space<vmem>>, %arg4: memref<224x128xf32, #tpu.memory_space<vmem>>, %arg5: memref<32x128xf32, #tpu.memory_space<vmem>>, %arg6: memref<1x128xf32, #tpu.memory_space<vmem>>, %arg7: memref<1x8x128xf32, #tpu.memory_space<vmem>>, %arg8: memref<8x96xf32, #tpu.memory_space<vmem>>) attributes {dimension_semantics = [#tpu.dimension_semantics<parallel>, #tpu.dimension_semantics<arbitrary>], iteration_bounds = array<i64: 1, 1>, scalar_prefetch = 0 : i64, scratch_operands = 1 : i64, tpu.core_type = #tpu.core_type<tc>, window_params = [{transform_indices = @transform_0, window_bounds = array<i64: 1, 8, 128>}, {transform_indices = @transform_1, window_bounds = array<i64: 8, 96>}, {pipeline_mode = #tpu.pipeline_mode<synchronous>, transform_indices = @transform_2, window_bounds = array<i64: 224, 128>}, {pipeline_mode = #tpu.pipeline_mode<synchronous>, transform_indices = @transform_3, window_bounds = array<i64: 32, 128>}, {pipeline_mode = #tpu.pipeline_mode<synchronous>, transform_indices = @transform_4, window_bounds = array<i64: 1, 128>}, {transform_indices = @transform_5, window_bounds = array<i64: 1, 8, 128>}]} {
    %c0_i32 = arith.constant 0 : i32
    %0 = arith.cmpi eq, %arg1, %c0_i32 : i32
    %1 = arith.extui %0 : i1 to i32
    %c0_i32_0 = arith.constant 0 : i32
    %2 = arith.cmpi ne, %1, %c0_i32_0 : i32
    scf.if %2 {
      %c0_30 = arith.constant 0 : index
      %c0_31 = arith.constant 0 : index
      %52 = vector.load %arg3[%c0_30, %c0_31] : memref<8x96xf32, #tpu.memory_space<vmem>>, vector<8x96xf32>
      %c0_32 = arith.constant 0 : index
      %c0_33 = arith.constant 0 : index
      %53 = vector.load %arg8[%c0_32, %c0_33] : memref<8x96xf32, #tpu.memory_space<vmem>>, vector<8x96xf32>
      tpu.vector_store %arg8[%c0_32, %c0_33], %52 {strides = array<i32>} : memref<8x96xf32, #tpu.memory_space<vmem>>, vector<8x96xf32>,
    } else {
    }
    %c0 = arith.constant 0 : index
    %c0_1 = arith.constant 0 : index
    %c0_2 = arith.constant 0 : index
    %3 = vector.load %arg2[%c0, %c0_1, %c0_2] : memref<1x8x128xf32, #tpu.memory_space<vmem>>, vector<1x8x128xf32>
    %4 = vector.shape_cast %3 : vector<1x8x128xf32> to vector<8x128xf32>
    %c0_3 = arith.constant 0 : index
    %c0_4 = arith.constant 0 : index
    %5 = vector.load %arg8[%c0_3, %c0_4] : memref<8x96xf32, #tpu.memory_space<vmem>>, vector<8x96xf32>
    %6 = tpu.concatenate %4, %5 in 1 : vector<8x128xf32>, vector<8x96xf32> -> vector<8x224xf32>
    %c0_5 = arith.constant 0 : index
    %c0_6 = arith.constant 0 : index
    %7 = vector.load %arg4[%c0_5, %c0_6] : memref<224x128xf32, #tpu.memory_space<vmem>>, vector<224x128xf32>
    %cst = arith.constant dense<0.000000e+00> : vector<8x128xf32>
    %8 = tpu.matmul %6, %7, %cst {dimension_numbers = #tpu.dot_dimension_numbers<[1], [0], [0], [1], [0, 0, 1, 1], [], []>} : vector<8x224xf32>, vector<224x128xf32>, vector<8x128xf32> -> vector<8x128xf32>
    %9 = vector.extract_strided_slice %8 {offsets = [0, 0], sizes = [8, 32], strides = [1, 1]} : vector<8x128xf32> to vector<8x32xf32>
    %cst_7 = arith.constant 0.000000e+00 : f32
    %10 = vector.broadcast %cst_7 : f32 to vector<8x32xf32>
    %11 = arith.maximumf %9, %10 : vector<8x32xf32>
    %c0_8 = arith.constant 0 : index
    %c0_9 = arith.constant 0 : index
    %12 = vector.load %arg5[%c0_8, %c0_9] : memref<32x128xf32, #tpu.memory_space<vmem>>, vector<32x32xf32>
    %cst_10 = arith.constant dense<0.000000e+00> : vector<8x32xf32>
    %13 = tpu.matmul %11, %12, %cst_10 {dimension_numbers = #tpu.dot_dimension_numbers<[1], [0], [0], [1], [0, 0, 1, 1], [], []>} : vector<8x32xf32>, vector<32x32xf32>, vector<8x32xf32> -> vector<8x32xf32>
    %14 = vector.extract_strided_slice %8 {offsets = [0, 32], sizes = [8, 32], strides = [1, 1]} : vector<8x128xf32> to vector<8x32xf32>
    %15 = arith.addf %13, %14 : vector<8x32xf32>
    %cst_11 = arith.constant 0.000000e+00 : f32
    %16 = vector.broadcast %cst_11 : f32 to vector<8x32xf32>
    %17 = arith.maximumf %15, %16 : vector<8x32xf32>
    %c0_12 = arith.constant 0 : index
    %c32 = arith.constant 32 : index
    %18 = vector.load %arg5[%c0_12, %c32] : memref<32x128xf32, #tpu.memory_space<vmem>>, vector<32x32xf32>
    %cst_13 = arith.constant dense<0.000000e+00> : vector<8x32xf32>
    %19 = tpu.matmul %17, %18, %cst_13 {dimension_numbers = #tpu.dot_dimension_numbers<[1], [0], [0], [1], [0, 0, 1, 1], [], []>} : vector<8x32xf32>, vector<32x32xf32>, vector<8x32xf32> -> vector<8x32xf32>
    %20 = vector.extract_strided_slice %8 {offsets = [0, 64], sizes = [8, 32], strides = [1, 1]} : vector<8x128xf32> to vector<8x32xf32>
    %21 = arith.addf %19, %20 : vector<8x32xf32>
    %cst_14 = arith.constant 0.000000e+00 : f32
    %22 = vector.broadcast %cst_14 : f32 to vector<8x32xf32>
    %23 = arith.maximumf %21, %22 : vector<8x32xf32>
    %c0_15 = arith.constant 0 : index
    %c64 = arith.constant 64 : index
    %24 = vector.load %arg5[%c0_15, %c64] : memref<32x128xf32, #tpu.memory_space<vmem>>, vector<32x32xf32>
    %cst_16 = arith.constant dense<0.000000e+00> : vector<8x32xf32>
    %25 = tpu.matmul %23, %24, %cst_16 {dimension_numbers = #tpu.dot_dimension_numbers<[1], [0], [0], [1], [0, 0, 1, 1], [], []>} : vector<8x32xf32>, vector<32x32xf32>, vector<8x32xf32> -> vector<8x32xf32>
    %26 = vector.extract_strided_slice %8 {offsets = [0, 96], sizes = [8, 32], strides = [1, 1]} : vector<8x128xf32> to vector<8x32xf32>
    %27 = arith.addf %25, %26 : vector<8x32xf32>
    %cst_17 = arith.constant 0.000000e+00 : f32
    %28 = vector.broadcast %cst_17 : f32 to vector<8x32xf32>
    %29 = arith.maximumf %27, %28 : vector<8x32xf32>
    %c0_18 = arith.constant 0 : index
    %c96 = arith.constant 96 : index
    %30 = vector.load %arg5[%c0_18, %c96] : memref<32x128xf32, #tpu.memory_space<vmem>>, vector<32x8xf32>
    %cst_19 = arith.constant dense<0.000000e+00> : vector<8x8xf32>
    %31 = tpu.matmul %29, %30, %cst_19 {dimension_numbers = #tpu.dot_dimension_numbers<[1], [0], [0], [1], [0, 0, 1, 1], [], []>} : vector<8x32xf32>, vector<32x8xf32>, vector<8x8xf32> -> vector<8x8xf32>
    %c0_20 = arith.constant 0 : index
    %c0_21 = arith.constant 0 : index
    %32 = vector.load %arg6[%c0_20, %c0_21] : memref<1x128xf32, #tpu.memory_space<vmem>>, vector<1x8xf32>
    %33 = vector.broadcast %32 : vector<1x8xf32> to vector<8x8xf32>
    %34 = arith.addf %31, %33 : vector<8x8xf32>
    %cst_22 = arith.constant dense<0xFF800000> : vector<8xf32>
    %35 = vector.multi_reduction <maximumf>, %34, %cst_22 [1] : vector<8x8xf32> to vector<8xf32>
    %36 = vector.shape_cast %35 : vector<8xf32> to vector<8x1xf32>
    %37 = vector.broadcast %36 : vector<8x1xf32> to vector<8x8xf32>
    %38 = arith.subf %34, %37 : vector<8x8xf32>
    %39 = math.exp %38 : vector<8x8xf32>
    %cst_23 = arith.constant dense<0.000000e+00> : vector<8xf32>
    %40 = vector.multi_reduction <add>, %39, %cst_23 [1] : vector<8x8xf32> to vector<8xf32>
    %41 = vector.shape_cast %40 : vector<8xf32> to vector<8x1xf32>
    %42 = math.log %41 : vector<8x1xf32>
    %43 = vector.broadcast %42 : vector<8x1xf32> to vector<8x8xf32>
    %44 = arith.subf %38, %43 : vector<8x8xf32>
    %45 = tpu.concatenate %17, %23, %29 in 1 : vector<8x32xf32>, vector<8x32xf32>, vector<8x32xf32> -> vector<8x96xf32>
    %c0_24 = arith.constant 0 : index
    %c0_25 = arith.constant 0 : index
    %46 = vector.load %arg8[%c0_24, %c0_25] : memref<8x96xf32, #tpu.memory_space<vmem>>, vector<8x96xf32>
    tpu.vector_store %arg8[%c0_24, %c0_25], %45 {strides = array<i32>} : memref<8x96xf32, #tpu.memory_space<vmem>>, vector<8x96xf32>,
    %cst_26 = arith.constant 0.000000e+00 : f32
    %47 = vector.broadcast %cst_26 : f32 to vector<8x24xf32>
    %48 = tpu.concatenate %45, %44, %47 in 1 : vector<8x96xf32>, vector<8x8xf32>, vector<8x24xf32> -> vector<8x128xf32>
    %c0_27 = arith.constant 0 : index
    %c0_28 = arith.constant 0 : index
    %c0_29 = arith.constant 0 : index
    %49 = vector.load %arg7[%c0_27, %c0_28, %c0_29] : memref<1x8x128xf32, #tpu.memory_space<vmem>>, vector<1x8x128xf32>
    %50 = vector.shape_cast %49 : vector<1x8x128xf32> to vector<8x128xf32>
    %51 = vector.shape_cast %48 : vector<8x128xf32> to vector<1x8x128xf32>
    tpu.vector_store %arg7[%c0_27, %c0_28, %c0_29], %51 {strides = array<i32>} : memref<1x8x128xf32, #tpu.memory_space<vmem>>, vector<1x8x128xf32>,
    return
  }
  func.func @transform_0(%arg0: i32, %arg1: i32) -> (i32, i32, i32) {
    %c0_i32 = arith.constant 0 : i32
    %c0_i32_0 = arith.constant 0 : i32
    return %arg1, %arg0, %c0_i32 : i32, i32, i32
  }
  func.func @transform_1(%arg0: i32, %arg1: i32) -> (i32, i32) {
    %c0_i32 = arith.constant 0 : i32
    %c0_i32_0 = arith.constant 0 : i32
    return %arg0, %c0_i32 : i32, i32
  }
  func.func @transform_2(%arg0: i32, %arg1: i32) -> (i32, i32) {
    %c0_i32 = arith.constant 0 : i32
    %c0_i32_0 = arith.constant 0 : i32
    %c0_i32_1 = arith.constant 0 : i32
    return %c0_i32, %c0_i32_0 : i32, i32
  }
  func.func @transform_3(%arg0: i32, %arg1: i32) -> (i32, i32) {
    %c0_i32 = arith.constant 0 : i32
    %c0_i32_0 = arith.constant 0 : i32
    %c0_i32_1 = arith.constant 0 : i32
    return %c0_i32, %c0_i32_0 : i32, i32
  }
  func.func @transform_4(%arg0: i32, %arg1: i32) -> (i32, i32) {
    %c0_i32 = arith.constant 0 : i32
    %c0_i32_0 = arith.constant 0 : i32
    %c0_i32_1 = arith.constant 0 : i32
    return %c0_i32, %c0_i32_0 : i32, i32
  }
  func.func @transform_5(%arg0: i32, %arg1: i32) -> (i32, i32, i32) {
    %c0_i32 = arith.constant 0 : i32
    %c0_i32_0 = arith.constant 0 : i32
    return %arg1, %arg0, %c0_i32 : i32, i32, i32
  }
}

</mosaic_0001>

<bundles_post_ra>
// kernel: tcrn_forward_sequence.1
= control target key start
LH: loop header
LB: loop body
LE: loop exit
PB: predicated region body
PF: predicated region fallthrough
CT: control target
= control target key end

     0   :  { %10 = vsyncpa [#allocation4], 0  ;;  %s380_s21 = smov [#allocation3]   ;;  %s381_s23 = smov 128   ;;  %s474_s0 = inlined_call_operand.vmem [shape: f32[1,8,128], index: 0, kind: input, shape index: {}]   ;;  %s475_s1 = inlined_call_operand.vmem [shape: f32[8,96], index: 1, kind: input, shape index: {}]   ;;  %s476_s2 = inlined_call_operand.hbm [shape: f32[224,128], index: 2, kind: input, shape index: {}]   ;;  %s477_s3 = inlined_call_operand.vmem [shape: f32[32,128], index: 3, kind: input, shape index: {}]   ;;  %s478_s4 = inlined_call_operand.vmem [shape: f32[1,128], index: 4, kind: input, shape index: {}]   ;;  %s479_s5 = inlined_call_operand.vmem [shape: f32[1,8,128], index: 5, kind: output, shape index: {}]  }
   0x1   :  { %s19_s20 = sshll.u32 %s476_s2, 4  ;;  %s21_s22 = sshll.u32 %s380_s21, 4  ;;  %s20_s20 = int_to_ptr.hbm [resolvable:$true] %s19_s20  ;;  %s22_s22 = int_to_ptr.vmem [resolvable:$true] %s21_s22 }
   0x2   :  { %s382_s24 = smov 8  }
   0x3   :  { %27 = dma.hbm_to_vmem [thread:$0]  %s20_s20, 3584, %s22_s22, [#allocation4], %s381_s23, %s381_s23, %s382_s24  }
   0x4   :  { %378 = dma.done.wait [#allocation4], 3584  }
   0x5   :  { %379 = vsyncadd [#allocation4], 4294963712  ;;  %v60_v0 = vld [vmem:[#allocation3 + $0x78] sm:$0xff]  ;;  %v59_v1 = vld [vmem:[#allocation3 + $0x70] sm:$0xff]  ;;  %vm41_vm0 = vcmask 785408   ;;  %s383_s8 = smov 96  }
   0x6   :  { %77 = vmatpush.msra.mxu0 %v60_v0  ;;  %v72_v2 = vld [vmem:[#allocation3 + $0xd8] sm:$0xff]  ;;  %v58_v3 = vld [vmem:[#allocation3 + $0x68] sm:$0xff]  ;;  %v71_v4 = vld [vmem:[#allocation3 + $0xd0] sm:$0xff]  ;;  %vm126_vm1 = vcmask 261120   ;;  %s385_s11 = smov 32   ;;  %vm292_vm2 = vcmask 523264  }
   0x7   :  { %101 = vmatpush.msra.mxu1 %v72_v2  ;;  %v70_v5 = vld [vmem:[#allocation3 + $0xc8] sm:$0xff]  ;;  %v57_v6 = vld [vmem:[#allocation3 + $0x60] sm:$0xff]  ;;  %v56_v8 = vld [vmem:[#allocation3 + $0x58] sm:$0xff]  ;;  %vm272_vm3 = vcmask 64512   ;;  %vm300_vm4 = vcmask 850944  }
   0x8   :  { %78 = vmatpush.msra.mxu0 %v59_v1  ;;  %v69_v7 = vld [vmem:[#allocation3 + $0xc0] sm:$0xff]  ;;  %v68_v9 = vld [vmem:[#allocation3 + $0xb8] sm:$0xff]  ;;  %v55_v10 = vld [vmem:[#allocation3 + $0x50] sm:$0xff] }
   0x9   :  { %102 = vmatpush.msra.mxu1 %v71_v4  ;;  %v54_v11 = vld [vmem:[#allocation3 + $0x48] sm:$0xff]  ;;  %v67_v12 = vld [vmem:[#allocation3 + $0xb0] sm:$0xff]  ;;  %v40_v13 = vld [vmem:[%s475_s1] sm:$0xff] }
   0xa   :  { %79 = vmatpush.msra.mxu0 %v58_v3  ;;  %42 = vst.msk [vmem:[#allocation2] sm:$0xff] %vm41_vm0, %v40_v13  ;;  %v118_v14 = vld [vmem:[%s477_s3] sm:$0xff]  ;;  %v119_v15 = vld [vmem:[%s477_s3 + $0x8] sm:$0xff]  ;;  %v120_v16 = vld [vmem:[%s477_s3 + $0x10] sm:$0xff] }
   0xb   :  { %103 = vmatpush.msra.mxu1 %v70_v5  ;;  %v66_v17 = vld [vmem:[#allocation3 + $0xa8] sm:$0xff]  ;;  %v432_v18 = vpack.i.bf16 %v118_v14, %v119_v15  ;;  %v121_v19 = vld [vmem:[%s477_s3 + $0x18] sm:$0xff]  ;;  %v53_v20 = vld [vmem:[#allocation3 + $0x40] sm:$0xff]  ;;  %s384_s3 = smov 64  }
   0xc   :  { %80 = vmatpush.msra.mxu0 %v57_v6  ;;  %v437_v21 = vpack.i.bf16 %v120_v16, %v121_v19  ;;  %142 = vmatpush.msra.mxu2 %v121_v19  ;;  %v65_v22 = vld [vmem:[#allocation3 + $0xa0] sm:$0xff]  ;;  %v52_v23 = vld [vmem:[#allocation3 + $0x38] sm:$0xff]  ;;  %v51_v25 = vld [vmem:[#allocation3 + $0x30] sm:$0xff] }
   0xd   :  { %104 = vmatpush.msra.mxu1 %v69_v7  ;;  %325 = vrot.lane.b32.xlu1 %v432_v18, %s383_s8  ;;  %v64_v24 = vld [vmem:[#allocation3 + $0x98] sm:$0xff]  ;;  %v63_v26 = vld [vmem:[#allocation3 + $0x90] sm:$0xff]  ;;  %v50_v27 = vld [vmem:[#allocation3 + $0x28] sm:$0xff] }
   0xe   :  { %81 = vmatpush.msra.mxu0 %v56_v8  ;;  %320 = vrot.lane.b32.xlu0 %v437_v21, %s383_s8  ;;  %v62_v28 = vld [vmem:[#allocation3 + $0x88] sm:$0xff]  ;;  %v49_v29 = vld [vmem:[#allocation3 + $0x20] sm:$0xff]  ;;  %v48_v31 = vld [vmem:[#allocation3 + $0x18] sm:$0xff] }
   0xf   :  { %105 = vmatpush.msra.mxu1 %v68_v9  ;;  %143 = vmatpush.msra.mxu2 %v120_v16  ;;  %v61_v30 = vld [vmem:[#allocation3 + $0x80] sm:$0xff]  ;;  %v47_v33 = vld [vmem:[#allocation3 + $0x10] sm:$0xff]  ;;  %v46_v34 = vld [vmem:[#allocation3 + $0x8] sm:$0xff] }
  0x10   :  { %82 = vmatpush.msra.mxu0 %v55_v10  ;;  %v45_v35 = vld [vmem:[#allocation3] sm:$0xff]  ;;  %v43_v36 = vld [vmem:[%s474_s0] sm:$0xff] }
  0x11   :  { %106 = vmatpush.msra.mxu1 %v67_v12  ;;  %144 = vmatpush.msra.mxu2 %v119_v15  ;;  %v44_v32 = vld [vmem:[#allocation2] sm:$0xff] }
  0x12   :  { %83 = vmatpush.msra.mxu0 %v54_v11  ;;  %v349_v11 = vld [vmem:[%s478_s4] ss:$0 sm:$0xff] }
  0x13   :  { %107 = vmatpush.msra.mxu1 %v66_v17  ;;  %145 = vmatpush.msra.mxu2 %v118_v14 }
  0x14   :  { %84 = vmatpush.msra.mxu0 %v53_v20 }
  0x15   :  { %108 = vmatpush.msra.mxu1 %v65_v22  ;;  %330 = vrot.lane.b32.xlu1 %v437_v21, %s384_s3 }
  0x16   :  { %85 = vmatpush.msra.mxu0 %v52_v23 }
  0x17   :  { %109 = vmatpush.msra.mxu1 %v64_v24 }
  0x18   :  { %86 = vmatpush.msra.mxu0 %v51_v25 }
  0x19   :  { %110 = vmatpush.msra.mxu1 %v63_v26 }
  0x1a   :  { %87 = vmatpush.msra.mxu0 %v50_v27 }
  0x1b   :  { %111 = vmatpush.msra.mxu1 %v62_v28 }
  0x1c   :  { %88 = vmatpush.msra.mxu0 %v49_v29 }
  0x1d   :  { %112 = vmatpush.msra.mxu1 %v61_v30 }
  0x1e   :  { %89 = vmatpush.msra.mxu0 %v48_v31  ;;  %308 = vmatmul.msk.f32.vlgmr.msra.gmra.mxu1 %vm41_vm0, %v44_v32 }
  0x20   :  { %90 = vmatpush.msra.mxu0 %v47_v33 }
  0x22   :  { %91 = vmatpush.msra.mxu0 %v46_v34 }
  0x24   :  { %92 = vmatpush.msra.mxu0 %v45_v35 }
  0x25   :  { %93 = vmatmul.f32.vlgmr.msra.gmra.mxu0 %v43_v36 }
  0x7f   :  { %v326_v44 = vpop.permute.xlu1 %325 }
  0x80   :  { %v321_v41 = vpop.permute.xlu0 %320  ;;  %v327_v45 = vunpack.i.l.bf16 %v326_v44  ;;  %v328_v46 = vunpack.i.h.bf16 %v326_v44 }
  0x81   :  { %v322_v42 = vunpack.i.l.bf16 %v321_v41  ;;  %v323_v43 = vunpack.i.h.bf16 %v321_v41 }
  0x83   :  { %185 = vmatpush.msra.mxu3 %v322_v42 }
  0x85   :  { %186 = vmatpush.msra.mxu3 %v323_v43 }
  0x87   :  { %187 = vmatpush.msra.mxu3 %v327_v45  ;;  %v331_v47 = vpop.permute.xlu1 %330 }
  0x88   :  { %v332_v48 = vunpack.i.l.bf16 %v331_v47  ;;  %v333_v53 = vunpack.i.h.bf16 %v331_v47 }
  0x89   :  { %188 = vmatpush.msra.mxu3 %v328_v46 }
  0x8a   :  { %224 = vmatpush.msrb.mxu2 %v332_v48 }
  0x8c   :  { %225 = vmatpush.msrb.mxu2 %v333_v53 }
  0x9b   :  { %v114_v37 = vpop.f32.mrf.mxu1 }
  0xa2   :  { %v94_v38 = vpop.f32.mrf.mxu0 }
  0xa3   :  { %v115_v39 = vadd.f32 %v114_v37, %v94_v38 }
  0xa5   :  { %206 = vrot.lane.b32.xlu1 %v115_v39, %s385_s11  ;;  %167 = vrot.lane.b32.xlu2 %v115_v39, %s384_s3  ;;  %v117_v40 = vmax.f32 %v115_v39, 0.0 }
  0xa6   :  { %123 = vrot.lane.b32.xlu0 %v115_v39, %s383_s8 }
  0xa7   :  { %309 = vmatmul.msk.f32.vlgmr.msra.gmra.mxu2 %vm126_vm1, %v117_v40 }
  0xad   :  { %335 = vrot.lane.b32.xlu2 %v432_v18, %s384_s3 }
  0xae   :  { %340 = vrot.lane.b32.xlu0 %v437_v21, %s385_s11 }
  0xb5   :  { %345 = vrot.lane.b32.xlu2 %v432_v18, %s385_s11 }
  0xff   :  { %v168_v54 = vpop.permute.xlu2 %167 }
 0x107   :  { %v336_v55 = vpop.permute.xlu2 %335 }
 0x108   :  { %v337_v56 = vunpack.i.l.bf16 %v336_v55  ;;  %v338_v57 = vunpack.i.h.bf16 %v336_v55 }
 0x10a   :  { %226 = vmatpush.msrb.mxu2 %v337_v56 }
 0x10c   :  { %227 = vmatpush.msrb.mxu2 %v338_v57 }
 0x10f   :  { %v346_v0 = vpop.permute.xlu2 %345 }
 0x110   :  { %v347_v1 = vunpack.i.l.bf16 %v346_v0  ;;  %v348_v2 = vunpack.i.h.bf16 %v346_v0 }
 0x117   :  { %v207_v3 = vpop.permute.xlu1 %206 }
 0x118   :  { %v124_v49 = vpop.permute.xlu0 %123 }
 0x120   :  { %v341_v61 = vpop.permute.xlu0 %340 }
 0x121   :  { %v342_v62 = vunpack.i.l.bf16 %v341_v61  ;;  %v343_v63 = vunpack.i.h.bf16 %v341_v61 }
 0x123   :  { %264 = vmatpush.msrb.mxu3 %v342_v62 }
 0x125   :  { %265 = vmatpush.msrb.mxu3 %v343_v63 }
 0x127   :  { %266 = vmatpush.msrb.mxu3 %v347_v1 }
 0x129   :  { %267 = vmatpush.msrb.mxu3 %v348_v2 }
 0x12a   :  { %v147_v50 = vpop.f32.mrf.mxu2 }
 0x12b   :  { %v148_v51 = vadd.f32 %v147_v50, %v124_v49 }
 0x12d   :  { %v150_v52 = vmax.f32 %v148_v51, 0.0 }
 0x12f   :  { %310 = vmatmul.msk.f32.vlgmr.msra.gmra.mxu3 %vm126_vm1, %v150_v52 }
 0x1b2   :  { %v190_v58 = vpop.f32.mrf.mxu3 }
 0x1b3   :  { %v191_v59 = vadd.f32 %v190_v58, %v168_v54 }
 0x1b5   :  { %v193_v60 = vmax.f32 %v191_v59, 0.0 }
 0x1b7   :  { %285 = vrot.lane.b32.xlu2 %v193_v60, %s385_s11  ;;  %311 = vmatmul.msk.f32.vlgmr.msrb.gmra.mxu2 %vm126_vm1, %v193_v60 }
 0x211   :  { %v286_v7 = vpop.permute.xlu2 %285 }
 0x212   :  { %v291_v8 = vsel %vm126_vm1, %v150_v52, %v286_v7 }
 0x23a   :  { %v229_v4 = vpop.f32.mrf.mxu2 }
 0x23b   :  { %v230_v5 = vadd.f32 %v229_v4, %v207_v3 }
 0x23d   :  { %v232_v6 = vmax.f32 %v230_v5, 0.0 }
 0x23f   :  { %288 = vrot.lane.b32.xlu2 %v232_v6, %s384_s3  ;;  %312 = vmatmul.msk.f32.vlgmr.msrb.gmra.mxu3 %vm126_vm1, %v232_v6 }
 0x299   :  { %v289_v9 = vpop.permute.xlu2 %288 }
 0x29a   :  { %v293_v10 = vsel %vm292_vm2, %v291_v8, %v289_v9 }
 0x29b   :  { %294 = vst.msk [vmem:[#allocation2] sm:$0xff] %vm41_vm0, %v293_v10 }
 0x2c2   :  { %v269_v12 = vpop.f32.mrf.mxu3 }
 0x2c3   :  { %v270_v13 = vadd.f32 %v349_v11, %v269_v12 }
 0x2c5   :  { %v273_v14 = vsel %vm272_vm3, %v270_v13, -inf }
 0x2c6   :  { %274 = vmax.xlane.f32.xlu0 %v273_v14 }
 0x339   :  { %v275_v15 = vpop.xlane.xlu0 %274 }
 0x33a   :  { %v276_v16 = vsub.f32 %v270_v13, %v275_v15 }
 0x33c   :  { %v277_v17 = vmul.f32 1.442695, %v276_v16 }
 0x33e   :  { %350 = vpow2.f32 %v277_v17 }
 0x344   :  { %v351_v18 = vpop.eup %350 }
 0x345   :  { %v279_v19 = vsel %vm272_vm3, %v351_v18, 0.0 }
 0x346   :  { %280 = vadd.xlane.f32.xlu1 %v279_v19 }
 0x3b9   :  { %v281_v20 = vpop.xlane.xlu1 %280 }
 0x3ba   :  { %352 = vlog2.f32 %v281_v20 }
 0x3c0   :  { %v353_v21 = vpop.eup %352 }
 0x3c1   :  { %v283_v22 = vmul.f32 0.6931472, %v353_v21 }
 0x3c3   :  { %v284_v23 = vsub.f32 %v276_v16, %v283_v22 }
 0x3c5   :  { %296 = vrot.lane.b32.xlu2 %v284_v23, %s383_s8 }
 0x41f   :  { %v297_v24 = vpop.permute.xlu2 %296 }
 0x420   :  { %v299_v25 = vsel %vm41_vm0, %v293_v10, %v297_v24 }
 0x421   :  { %v301_v26 = vsel %vm300_vm4, %v299_v25, 0.0 }
 0x422   :  { %302 = vst [vmem:[%s479_s5] sm:$0xff] %v301_v26 }
 0x423   :  { %307 = vsyncpa [#allocation4], 1 }

</bundles_post_ra>
